<compile_context>
chip_gen: v6e
topology: v6e:2x2x1
jax: 0.10.0
libtpu: 0.0.40
codegen_flags: <defaults>
</compile_context>

<pallas_src>
import jax
import jax.numpy as jnp
from jax.experimental import pallas as pl
from jax.experimental.pallas import tpu as pltpu

_LANES = 1024                       # lane-dense slab width (large multiple of 128)
_SUBLANES = 8
_TARGET_BLOCK_BYTES = 2 * 1024 * 1024  # ~2 MiB per input buffer (per grid step)


def _round_up(x, m):
    return ((x + m - 1) // m) * m


def _pick_block_rows(rows, itemsize):
    """Rows per grid step: ~2 MiB per input block, multiple of 8 sublanes."""
    target = max(_SUBLANES, _TARGET_BLOCK_BYTES // (_LANES * itemsize))
    target = _round_up(target, _SUBLANES)
    return min(target, _round_up(rows, _SUBLANES))


def _sigmoid_density_kernel(alpha_ref, sdf_ref, out_ref):
    """Elementwise: out = alpha * sigmoid(-sdf * alpha); alpha is an SMEM scalar."""
    alpha = alpha_ref[0]                               # scalar 1/beta from SMEM
    x = sdf_ref[...].astype(jnp.float32)               # f32 math on every generation
    dens = alpha * jax.nn.sigmoid(-x * alpha)          # sigmoid exp -> EUP slot
    out_ref[...] = dens.astype(out_ref.dtype)          # wide store in original dtype


def _sigmoid_density_2d(sdf_2d, alpha_scalar):
    """sdf_2d: (rows, _LANES) float array.  alpha_scalar: (1,) float32."""
    rows, lanes = sdf_2d.shape
    assert lanes == _LANES
    block_rows = _pick_block_rows(rows, sdf_2d.dtype.itemsize)
    grid = (pl.cdiv(rows, block_rows),)                # partial last block is masked
    return pl.pallas_call(
        _sigmoid_density_kernel,
        out_shape=jax.ShapeDtypeStruct((rows, lanes), sdf_2d.dtype),
        grid_spec=pltpu.PrefetchScalarGridSpec(
            num_scalar_prefetch=0,
            grid=grid,
            in_specs=[
                pl.BlockSpec(memory_space=pltpu.MemorySpace.SMEM),     # alpha scalar
                pl.BlockSpec((block_rows, lanes), lambda i: (i, 0)),
            ],
            out_specs=pl.BlockSpec((block_rows, lanes), lambda i: (i, 0)),
        ),
        compiler_params=pltpu.CompilerParams(
            dimension_semantics=("parallel",),   # shard row-blocks across TCs (v7x)
        ),
    )(alpha_scalar, sdf_2d)


class SigmoidDensity:
    """JAX/Pallas port of nerfstudio SigmoidDensity (forward only)."""

    def __init__(self, init_val, beta_min=0.0001):
        # deterministic parameter init, matching the PyTorch __init__ shapes (1,)
        self.beta_min = jnp.full((1,), beta_min, dtype=jnp.float32)
        self.beta = jnp.full((1,), init_val, dtype=jnp.float32)

    def get_beta(self):
        return jnp.abs(self.beta) + self.beta_min

    def __call__(self, sdf, beta=None):
        # Glue: resolve effective beta and precompute alpha = 1/beta once (scalar).
        if beta is None:
            beta_val = self.get_beta()
        else:
            # Matches PyTorch semantics for scalar / shape-(1,) beta overrides.
            # TODO(synk): per-sample (batched) beta override is not supported by
            # the scalar-SMEM kernel path; only the leading element is used.
            beta_val = jnp.reshape(jnp.asarray(beta, dtype=jnp.float32), (-1,))[:1]
        alpha_val = (1.0 / beta_val).astype(jnp.float32)

        orig_shape = sdf.shape
        orig_dtype = sdf.dtype
        flat = jnp.reshape(sdf, (-1,))       # keep original dtype; kernel casts
        n = flat.shape[0]
        if n == 0:
            return jnp.reshape(flat, orig_shape)

        n_main = (n // _LANES) * _LANES
        pieces = []
        if n_main > 0:
            main_2d = jnp.reshape(flat[:n_main], (n_main // _LANES, _LANES))
            out_main = _sigmoid_density_2d(main_2d, alpha_val)
            pieces.append(jnp.reshape(out_main, (-1,)))
        if n_main < n:
            # < _LANES leftover elements: negligible work, do it in plain JAX.
            tail = flat[n_main:].astype(jnp.float32)
            a = alpha_val[0]
            pieces.append((a * jax.nn.sigmoid(-tail * a)).astype(orig_dtype))
        out_flat = pieces[0] if len(pieces) == 1 else jnp.concatenate(pieces)
        return jnp.reshape(out_flat, orig_shape)


if __name__ == "__main__":
    key = jax.random.PRNGKey(0)
    module = SigmoidDensity(init_val=0.1, beta_min=0.0001)

    # small batch-shaped sdf input, e.g. (bs=2, num_samples=4, 16, 16)
    sdf = jax.random.normal(key, (2, 4, 16, 16), dtype=jnp.float32)

    out = jax.block_until_ready(module(sdf))                       # learnable beta
    out_override = jax.block_until_ready(module(sdf, beta=0.05))   # explicit beta

    # pure-JAX references
    beta_ref = jnp.abs(module.beta) + module.beta_min
    alpha_ref = 1.0 / beta_ref
    ref = alpha_ref * jax.nn.sigmoid(-sdf * alpha_ref)
    assert out.shape == sdf.shape
    assert jnp.allclose(out, ref, atol=1e-5, rtol=1e-5)

    ref_o = (1.0 / 0.05) * jax.nn.sigmoid(-sdf * (1.0 / 0.05))
    assert out_override.shape == sdf.shape
    assert jnp.allclose(out_override, ref_o, atol=1e-4, rtol=1e-5)

    # unaligned size: exercises the tiny plain-JAX tail + concat path
    sdf_u = jax.random.normal(jax.random.PRNGKey(1), (2, 1050), dtype=jnp.float32)
    out_u = jax.block_until_ready(module(sdf_u))
    ref_u = alpha_ref * jax.nn.sigmoid(-sdf_u * alpha_ref)
    assert jnp.allclose(out_u, ref_u, atol=1e-5, rtol=1e-5)

    # bf16 input: cast handled in-kernel, output stays bf16, larger row blocks
    sdf_bf = sdf.astype(jnp.bfloat16)
    out_bf = jax.block_until_ready(module(sdf_bf))
    assert out_bf.dtype == jnp.bfloat16
    ref_bf = alpha_ref * jax.nn.sigmoid(-sdf_bf.astype(jnp.float32) * alpha_ref)
    assert jnp.allclose(out_bf.astype(jnp.float32), ref_bf, atol=5e-2, rtol=5e-2)

    print("KERNEL_OK")
</pallas_src>

<mosaic_0001>
module attributes {stable_mosaic.version = 11 : i64} {
  func.func @_sigmoid_density_kernel(%arg0: i32, %arg1: memref<1xf32, #tpu.memory_space<smem>>, %arg2: memref<8x1024xf32, #tpu.memory_space<vmem>>, %arg3: memref<8x1024xf32, #tpu.memory_space<vmem>>) attributes {dimension_semantics = [#tpu.dimension_semantics<parallel>], iteration_bounds = array<i64: 1>, scalar_prefetch = 0 : i64, scratch_operands = 0 : i64, tpu.core_type = #tpu.core_type<tc>, window_params = [{transform_indices = @transform_0, window_bounds = array<i64: 1>}, {transform_indices = @transform_1, window_bounds = array<i64: 8, 1024>}, {transform_indices = @transform_2, window_bounds = array<i64: 8, 1024>}]} {
    %c0 = arith.constant 0 : index
    %0 = memref.load %arg1[%c0] : memref<1xf32, #tpu.memory_space<smem>>
    %c0_0 = arith.constant 0 : index
    %c0_1 = arith.constant 0 : index
    %1 = vector.load %arg2[%c0_0, %c0_1] : memref<8x1024xf32, #tpu.memory_space<vmem>>, vector<8x1024xf32>
    %cst = arith.constant 0.000000e+00 : f32
    %2 = vector.broadcast %cst : f32 to vector<8x1024xf32>
    %3 = arith.subf %2, %1 : vector<8x1024xf32>
    %4 = vector.broadcast %0 : f32 to vector<8x1024xf32>
    %5 = arith.mulf %3, %4 : vector<8x1024xf32>
    %6 = arith.negf %5 : vector<8x1024xf32>
    %7 = math.exp %6 : vector<8x1024xf32>
    %cst_2 = arith.constant 1.000000e+00 : f32
    %8 = vector.broadcast %cst_2 : f32 to vector<8x1024xf32>
    %9 = arith.addf %8, %7 : vector<8x1024xf32>
    %10 = arith.divf %8, %9 : vector<8x1024xf32>
    %11 = vector.broadcast %0 : f32 to vector<8x1024xf32>
    %12 = arith.mulf %11, %10 : vector<8x1024xf32>
    %c0_3 = arith.constant 0 : index
    %c0_4 = arith.constant 0 : index
    %13 = vector.load %arg3[%c0_3, %c0_4] : memref<8x1024xf32, #tpu.memory_space<vmem>>, vector<8x1024xf32>
    tpu.vector_store %arg3[%c0_3, %c0_4], %12 {strides = array<i32>} : memref<8x1024xf32, #tpu.memory_space<vmem>>, vector<8x1024xf32>,
    return
  }
  func.func @transform_0(%arg0: i32) -> i32 {
    %c0_i32 = arith.constant 0 : i32
    %c0_i32_0 = arith.constant 0 : i32
    return %c0_i32 : i32
  }
  func.func @transform_1(%arg0: i32) -> (i32, i32) {
    %c0_i32 = arith.constant 0 : i32
    %c0_i32_0 = arith.constant 0 : i32
    return %arg0, %c0_i32 : i32, i32
  }
  func.func @transform_2(%arg0: i32) -> (i32, i32) {
    %c0_i32 = arith.constant 0 : i32
    %c0_i32_0 = arith.constant 0 : i32
    return %arg0, %c0_i32 : i32, i32
  }
}

</mosaic_0001>

<bundles_post_ra>
// kernel: tpu_custom_call.1
= control target key start
LH: loop header
LB: loop body
LE: loop exit
PB: predicated region body
PF: predicated region fallthrough
CT: control target
= control target key end

     0   :  { %8 = vsyncpa [#allocation4], 0  ;;  %s274_s0 = inlined_call_operand.<no memory space> [shape: f32[1], index: 0, kind: input, shape index: {}]   ;;  %s275_s1 = inlined_call_operand.hbm [shape: f32[2,1024], index: 1, kind: input, shape index: {}]   ;;  %s276_s2 = inlined_call_operand.hbm [shape: f32[2,1024], index: 2, kind: output, shape index: {}]  }
   0x1   :  { %9 = vsyncpa [#allocation5], 0 }
   0x2   :  { %16 = vsyncadd [#allocation4], 768  ;;  %s222_s9 = smov [#allocation3]  }
   0x3   :  { %s17_s10 = sshll.u32 %s222_s9, 4  ;;  %s18_s10 = int_to_ptr.vmem [resolvable:$true] %s17_s10 }
   0x4   :  { %s186_s11 = scalar_lea.vmem %s18_s10, 256  ;;  %s190_s12 = scalar_lea.vmem %s18_s10, 1024 }
   0x5   :  { %p187_p0 = scmp.ne.s32.totalorder %s18_s10, %s186_s11  ;;  %p191_p1 = scmp.lt.s32.totalorder %s18_s10, %s18_s10 }
   0x6   :  { %p192_p2 = scmp.lt.s32.totalorder %s190_s12, %s186_s11 }
   0x8   :  { %p193_p3 = por %p192_p2, %p191_p1 }
   0xa   :  { %p194_p4 = pnand %p193_p3, %p187_p0 }
   0xc   :  { %197 = shalt.err (!%p194_p4)
}
   0xd   :  { %s223_s13 = smov 256   ;;  %s224_s14 = smov 16  }
   0xe   :  { %23 = dma.hbm_to_vmem [thread:$0]  %s275_s1, 256, %s18_s10, [#allocation4], %s223_s13, %s223_s13, %s224_s14  }
   0xf   :  { %218 = dma.done.wait [#allocation4], 1024  }
  0x10   :  { %219 = vsyncadd [#allocation4], 4294966272  ;;  %v28_v0 = vld [vmem:[#allocation3] sm:$0xff]  ;;  %v250_v1 = vstv %s274_s0  ;;  %v29_v2 = vld [vmem:[#allocation3 + $0x8] sm:$0xff] }
  0x11   :  { %v30_v3 = vld [vmem:[#allocation3 + $0x10] sm:$0xff]  ;;  %v36_v4 = vsub.f32 0.0, %v28_v0  ;;  %v37_v5 = vsub.f32 0.0, %v29_v2  ;;  %v31_v7 = vld [vmem:[#allocation3 + $0x18] sm:$0xff]  ;;  %v32_v8 = vld [vmem:[#allocation3 + $0x20] sm:$0xff] }
  0x12   :  { %v38_v6 = vsub.f32 0.0, %v30_v3  ;;  %v33_v9 = vld [vmem:[#allocation3 + $0x28] sm:$0xff]  ;;  %v39_v10 = vsub.f32 0.0, %v31_v7  ;;  %v40_v11 = vsub.f32 0.0, %v32_v8  ;;  %v34_v13 = vld [vmem:[#allocation3 + $0x30] sm:$0xff]  ;;  %v35_v14 = vld [vmem:[#allocation3 + $0x38] sm:$0xff] }
  0x13   :  { %v41_v12 = vsub.f32 0.0, %v33_v9  ;;  %v45_v15 = vmul.f32 %v250_v1, %v36_v4  ;;  %v46_v16 = vmul.f32 %v250_v1, %v37_v5  ;;  %v42_v18 = vsub.f32 0.0, %v34_v13 }
  0x14   :  { %v47_v17 = vmul.f32 %v250_v1, %v38_v6  ;;  %v48_v19 = vmul.f32 %v250_v1, %v39_v10  ;;  %v49_v20 = vmul.f32 %v250_v1, %v40_v11  ;;  %v43_v22 = vsub.f32 0.0, %v35_v14 }
  0x15   :  { %v50_v21 = vmul.f32 %v250_v1, %v41_v12  ;;  %v134_v23 = vmul.f32 -1.442695, %v45_v15  ;;  %v135_v24 = vmul.f32 -1.442695, %v46_v16  ;;  %v51_v26 = vmul.f32 %v250_v1, %v42_v18 }
  0x16   :  { %v136_v25 = vmul.f32 -1.442695, %v47_v17  ;;  %v137_v27 = vmul.f32 -1.442695, %v48_v19  ;;  %v52_v28 = vmul.f32 %v250_v1, %v43_v22  ;;  %v138_v29 = vmul.f32 -1.442695, %v49_v20 }
  0x17   :  { %146 = vpow2.f32 %v134_v23  ;;  %v139_v30 = vmul.f32 -1.442695, %v50_v21  ;;  %v140_v31 = vmul.f32 -1.442695, %v51_v26 }
  0x18   :  { %148 = vpow2.f32 %v135_v24  ;;  %v141_v32 = vmul.f32 -1.442695, %v52_v28 }
  0x19   :  { %150 = vpow2.f32 %v136_v25 }
  0x1a   :  { %152 = vpow2.f32 %v137_v27 }
  0x1b   :  { %154 = vpow2.f32 %v138_v29 }
  0x1c   :  { %156 = vpow2.f32 %v139_v30 }
  0x1d   :  { %158 = vpow2.f32 %v140_v31 }
  0x1e   :  { %160 = vpow2.f32 %v141_v32 }
  0x24   :  { %v147_v33 = vpop.eup %146 }
  0x25   :  { %v149_v34 = vpop.eup %148  ;;  %v77_v35 = vadd.f32 1.0, %v147_v33 }
  0x26   :  { %v151_v36 = vpop.eup %150  ;;  %v78_v37 = vadd.f32 1.0, %v149_v34 }
  0x27   :  { %v153_v38 = vpop.eup %152  ;;  %162 = vrcp.f32 %v77_v35  ;;  %v79_v39 = vadd.f32 1.0, %v151_v36 }
  0x28   :  { %v155_v40 = vpop.eup %154  ;;  %164 = vrcp.f32 %v78_v37  ;;  %v80_v41 = vadd.f32 1.0, %v153_v38 }
  0x29   :  { %v157_v42 = vpop.eup %156  ;;  %166 = vrcp.f32 %v79_v39  ;;  %v81_v43 = vadd.f32 1.0, %v155_v40 }
  0x2a   :  { %v159_v44 = vpop.eup %158  ;;  %168 = vrcp.f32 %v80_v41  ;;  %v82_v45 = vadd.f32 1.0, %v157_v42 }
  0x2b   :  { %v161_v46 = vpop.eup %160  ;;  %170 = vrcp.f32 %v81_v43  ;;  %v83_v47 = vadd.f32 1.0, %v159_v44 }
  0x2c   :  { %172 = vrcp.f32 %v82_v45  ;;  %v84_v48 = vadd.f32 1.0, %v161_v46 }
  0x2d   :  { %174 = vrcp.f32 %v83_v47 }
  0x2e   :  { %176 = vrcp.f32 %v84_v48 }
  0x34   :  { %v163_v49 = vpop.eup %162 }
  0x35   :  { %v165_v50 = vpop.eup %164  ;;  %v101_v51 = vmul.f32 %v163_v49, %v250_v1 }
  0x36   :  { %v167_v52 = vpop.eup %166  ;;  %v102_v53 = vmul.f32 %v165_v50, %v250_v1 }
  0x37   :  { %v169_v54 = vpop.eup %168  ;;  %109 = vst [vmem:[#allocation6] sm:$0xff] %v101_v51  ;;  %v103_v55 = vmul.f32 %v167_v52, %v250_v1 }
  0x38   :  { %v171_v56 = vpop.eup %170  ;;  %110 = vst [vmem:[#allocation6 + $0x8] sm:$0xff] %v102_v53  ;;  %v104_v57 = vmul.f32 %v169_v54, %v250_v1 }
  0x39   :  { %v173_v58 = vpop.eup %172  ;;  %111 = vst [vmem:[#allocation6 + $0x10] sm:$0xff] %v103_v55  ;;  %v105_v59 = vmul.f32 %v171_v56, %v250_v1 }
  0x3a   :  { %v175_v60 = vpop.eup %174  ;;  %112 = vst [vmem:[#allocation6 + $0x18] sm:$0xff] %v104_v57  ;;  %v106_v61 = vmul.f32 %v173_v58, %v250_v1 }
  0x3b   :  { %v177_v62 = vpop.eup %176  ;;  %113 = vst [vmem:[#allocation6 + $0x20] sm:$0xff] %v105_v59  ;;  %v107_v63 = vmul.f32 %v175_v60, %v250_v1 }
  0x3c   :  { %114 = vst [vmem:[#allocation6 + $0x28] sm:$0xff] %v106_v61  ;;  %v108_v0 = vmul.f32 %v177_v62, %v250_v1 }
  0x3d   :  { %115 = vst [vmem:[#allocation6 + $0x30] sm:$0xff] %v107_v63 }
  0x3e   :  { %116 = vst [vmem:[#allocation6 + $0x38] sm:$0xff] %v108_v0 }
  0x3f   :  { %121 = vsyncadd [#allocation5], 768  ;;  %s225_s0 = smov [#allocation6]  }
  0x40   :  { %s122_s1 = sshll.u32 %s225_s0, 4  ;;  %s123_s1 = int_to_ptr.vmem [resolvable:$true] %s122_s1 }
  0x41   :  { %s198_s19 = scalar_lea.vmem %s123_s1, 256  ;;  %s202_s20 = scalar_lea.vmem %s123_s1, 1024 }
  0x42   :  { %p199_p5 = scmp.ne.s32.totalorder %s123_s1, %s198_s19  ;;  %p203_p6 = scmp.lt.s32.totalorder %s123_s1, %s123_s1 }
  0x43   :  { %p204_p7 = scmp.lt.s32.totalorder %s202_s20, %s198_s19 }
  0x45   :  { %p205_p8 = por %p204_p7, %p203_p6 }
  0x47   :  { %p206_p9 = pnand %p205_p8, %p199_p5 }
  0x49   :  { %209 = shalt.err (!%p206_p9)
}
  0x4a   :  { %128 = dma.vmem_to_hbm [thread:$0]  %s123_s1, 256, %s276_s2, [#allocation5], %s223_s13, %s223_s13, %s224_s14  }
  0x4b   :  { %220 = dma.done.wait [#allocation5], 1024  }
  0x4c   :  { %221 = vsyncadd [#allocation5], 4294966272 }
  0x4d   :  { %132 = vsyncpa [#allocation4], 1 }
  0x4e   :  { %133 = vsyncpa [#allocation5], 1 }

</bundles_post_ra>
